<compile_context>
chip_gen: v7x
topology: tpu7x:2x2x1
jax: 0.10.0
libtpu: 0.0.40
codegen_flags: <defaults>
</compile_context>

<pallas_src>
import functools
import jax
import jax.numpy as jnp
from jax import lax
from jax.experimental import pallas as pl
from jax.experimental.pallas import tpu as pltpu

_VMEM_LIMIT = 32 * 1024 * 1024  # explicit scoped-VMEM budget (safe on v5e/v6e/v7x)


def _pick_tile(dim, target):
    """Largest clean tile: target if it divides dim, else the full dim (small cases)."""
    if dim <= target:
        return dim
    return target if dim % target == 0 else dim


# ---------------------------------------------------------------------------
# Pallas kernels
# ---------------------------------------------------------------------------

def _linear_kernel(x_ref, w_ref, b_ref, o_ref, *, activation):
    # x: (tn, Din), w: (Din, td)  (already transposed), b: (1, td) -> o: (tn, td)
    x = x_ref[...].astype(jnp.float32)
    w = w_ref[...].astype(jnp.float32)
    y = jnp.dot(x, w, preferred_element_type=jnp.float32) + b_ref[...].astype(jnp.float32)
    if activation == "relu":
        y = jnp.maximum(y, 0.0)
    o_ref[...] = y.astype(o_ref.dtype)


def linear(x, w_t, b, activation=None, *, row_tile=256, col_tile=512):
    """y = x @ w_t + b, with w_t already in (Din, Dout) layout."""
    N, Din = x.shape
    Dout = w_t.shape[1]
    tn = _pick_tile(N, row_tile)
    td = _pick_tile(Dout, col_tile)
    b2 = b.reshape(1, Dout)
    return pl.pallas_call(
        functools.partial(_linear_kernel, activation=activation),
        out_shape=jax.ShapeDtypeStruct((N, Dout), x.dtype),
        grid=(N // tn, Dout // td),
        in_specs=[
            pl.BlockSpec((tn, Din), lambda i, j: (i, 0)),
            pl.BlockSpec((Din, td), lambda i, j: (0, j)),
            pl.BlockSpec((1, td), lambda i, j: (0, j)),
        ],
        out_specs=pl.BlockSpec((tn, td), lambda i, j: (i, j)),
        compiler_params=pltpu.CompilerParams(
            dimension_semantics=("parallel", "parallel"),
            vmem_limit_bytes=_VMEM_LIMIT),
    )(x, w_t, b2)


def _linear_add_ln_kernel(x_ref, w_ref, b_ref, r_ref, g_ref, be_ref, o_ref, *, eps):
    # (matmul + bias) -> + residual -> LayerNorm over last dim, all fused.
    x = x_ref[...].astype(jnp.float32)
    w = w_ref[...].astype(jnp.float32)
    y = jnp.dot(x, w, preferred_element_type=jnp.float32) + b_ref[...].astype(jnp.float32)
    z = y + r_ref[...].astype(jnp.float32)
    mu = jnp.mean(z, axis=-1, keepdims=True)
    var = jnp.mean((z - mu) ** 2, axis=-1, keepdims=True)
    zn = (z - mu) * lax.rsqrt(var + eps)
    o_ref[...] = (zn * g_ref[...].astype(jnp.float32)
                  + be_ref[...].astype(jnp.float32)).astype(o_ref.dtype)


def linear_add_layernorm(x, w_t, b, residual, gamma, beta, eps=1e-5, *, row_tile=256):
    """LayerNorm(residual + x @ w_t + b).  Output columns stay full-width (LN needs the row)."""
    N, Din = x.shape
    D = w_t.shape[1]
    tn = _pick_tile(N, row_tile)
    return pl.pallas_call(
        functools.partial(_linear_add_ln_kernel, eps=eps),
        out_shape=jax.ShapeDtypeStruct((N, D), x.dtype),
        grid=(N // tn,),
        in_specs=[
            pl.BlockSpec((tn, Din), lambda i: (i, 0)),
            pl.BlockSpec((Din, D), lambda i: (0, 0)),
            pl.BlockSpec((1, D), lambda i: (0, 0)),
            pl.BlockSpec((tn, D), lambda i: (i, 0)),
            pl.BlockSpec((1, D), lambda i: (0, 0)),
            pl.BlockSpec((1, D), lambda i: (0, 0)),
        ],
        out_specs=pl.BlockSpec((tn, D), lambda i: (i, 0)),
        compiler_params=pltpu.CompilerParams(
            dimension_semantics=("parallel",),
            vmem_limit_bytes=_VMEM_LIMIT),
    )(x, w_t, b.reshape(1, D), residual, gamma.reshape(1, D), beta.reshape(1, D))


def _attn_kernel(q_ref, k_ref, v_ref, kp_ref, am_ref, o_ref, *, nhead, scale):
    # One batch per grid step.  q/k/v blocks: (1, S, D); kp: (1, 1, S); am: (S, S).
    q = q_ref[0].astype(jnp.float32) * scale      # (S, D)
    k = k_ref[0].astype(jnp.float32)              # (S, D)
    v = v_ref[0].astype(jnp.float32)              # (S, D)
    bias = am_ref[...].astype(jnp.float32) + kp_ref[0].astype(jnp.float32)  # (S, S)

    S, D = q.shape
    hd = D // nhead
    outs = []
    for h in range(nhead):                        # unrolled, static head slices
        sl = slice(h * hd, (h + 1) * hd)
        qh, kh, vh = q[:, sl], k[:, sl], v[:, sl]
        # q @ k^T expressed directly as a contraction (no in-kernel transpose).
        s = lax.dot_general(qh, kh, (((1,), (1,)), ((), ())),
                            preferred_element_type=jnp.float32)
        s = s + bias
        s = s - jnp.max(s, axis=-1, keepdims=True)
        p = jnp.exp(s)
        denom = jnp.sum(p, axis=-1, keepdims=True)
        p = p * pl.reciprocal(denom, approx=True)
        outs.append(jnp.dot(p, vh, preferred_element_type=jnp.float32))
    o_ref[0] = jnp.concatenate(outs, axis=-1).astype(o_ref.dtype)  # lane-dense (S, D) store


def attention(q, k, v, kp_bias, attn_bias, nhead, scale):
    """q, k, v: (B, S, D); kp_bias: (B, 1, S) additive; attn_bias: (S, S) additive."""
    B, S, D = q.shape
    return pl.pallas_call(
        functools.partial(_attn_kernel, nhead=nhead, scale=scale),
        out_shape=jax.ShapeDtypeStruct((B, S, D), q.dtype),
        grid=(B,),
        in_specs=[
            pl.BlockSpec((1, S, D), lambda b: (b, 0, 0)),
            pl.BlockSpec((1, S, D), lambda b: (b, 0, 0)),
            pl.BlockSpec((1, S, D), lambda b: (b, 0, 0)),
            pl.BlockSpec((1, 1, S), lambda b: (b, 0, 0)),
            pl.BlockSpec((S, S), lambda b: (0, 0)),
        ],
        out_specs=pl.BlockSpec((1, S, D), lambda b: (b, 0, 0)),
        compiler_params=pltpu.CompilerParams(
            dimension_semantics=("parallel",),
            vmem_limit_bytes=_VMEM_LIMIT),
    )(q, k, v, kp_bias, attn_bias)


# ---------------------------------------------------------------------------
# Encoder layer / encoder stack (glue)
# ---------------------------------------------------------------------------

def encoder_layer_forward(src_bsd, params, kp_bias, pos_bsd, attn_bias, nhead):
    """One DETR-style encoder layer.  src_bsd: (B, S, D)."""
    B, S, D = src_bsd.shape
    hd = D // nhead
    scale = 1.0 / float(hd) ** 0.5

    with_pos = src_bsd if pos_bsd is None else src_bsd + pos_bsd
    qk_flat = with_pos.reshape(B * S, D)
    src_flat = src_bsd.reshape(B * S, D)

    # Fused Q+K projection (shared input src+pos); V projection from src.
    qk = linear(qk_flat, params["w_qk_t"], params["b_qk"])      # (N, 2D)
    v = linear(src_flat, params["wv_t"], params["bv"])          # (N, D)
    q3 = qk[:, :D].reshape(B, S, D)
    k3 = qk[:, D:].reshape(B, S, D)
    v3 = v.reshape(B, S, D)

    attn = attention(q3, k3, v3, kp_bias, attn_bias, nhead, scale)   # (B, S, D)
    attn_flat = attn.reshape(B * S, D)

    # out-projection fused with residual + LN1.
    x = linear_add_layernorm(attn_flat, params["wo_t"], params["bo"],
                             src_flat, params["ln1_g"], params["ln1_b"])

    # FFN: w1 + bias + relu in one kernel; w2 fused with residual + LN2.
    h = linear(x, params["w1_t"], params["b1"], activation="relu")
    x = linear_add_layernorm(h, params["w2_t"], params["b2"],
                             x, params["ln2_g"], params["ln2_b"])

    return x.reshape(B, S, D)


def transformer_encoder(src, stacked_params, key_padding_mask=None,
                        pos_enc=None, attn_mask=None, *, nhead=4):
    """Mirror of TransformerEncoder.forward.  src, pos_enc: (S, B, D) (PyTorch layout)."""
    S, B, D = src.shape
    # One layout transpose per encoder (not per layer); tokens stay (B, S, D) internally.
    src_bsd = jnp.transpose(src, (1, 0, 2))
    pos_bsd = None if pos_enc is None else jnp.transpose(pos_enc, (1, 0, 2))

    if key_padding_mask is not None:
        kp_bias = jnp.where(key_padding_mask, -1e9, 0.0).astype(jnp.float32)[:, None, :]
    else:
        kp_bias = jnp.zeros((B, 1, S), jnp.float32)
    if attn_mask is not None:
        if attn_mask.dtype == jnp.bool_:
            attn_bias = jnp.where(attn_mask, -1e9, 0.0).astype(jnp.float32)
        else:
            attn_bias = attn_mask.astype(jnp.float32)
    else:
        attn_bias = jnp.zeros((S, S), jnp.float32)

    def body(carry, layer_params):
        out = encoder_layer_forward(carry, layer_params, kp_bias, pos_bsd,
                                    attn_bias, nhead)
        return out, None

    out_bsd, _ = lax.scan(body, src_bsd, stacked_params)
    return jnp.transpose(out_bsd, (1, 0, 2))                    # back to (S, B, D)


# ---------------------------------------------------------------------------
# Deterministic parameter init (PyTorch layout) + kernel-layout preparation
# ---------------------------------------------------------------------------

def init_layer_params(key, d_model, dim_ff):
    ks = jax.random.split(key, 6)
    s = 0.02
    f32 = jnp.float32
    return {
        "wq": jax.random.normal(ks[0], (d_model, d_model), f32) * s,
        "bq": jnp.zeros((d_model,), f32),
        "wk": jax.random.normal(ks[1], (d_model, d_model), f32) * s,
        "bk": jnp.zeros((d_model,), f32),
        "wv": jax.random.normal(ks[2], (d_model, d_model), f32) * s,
        "bv": jnp.zeros((d_model,), f32),
        "wo": jax.random.normal(ks[3], (d_model, d_model), f32) * s,
        "bo": jnp.zeros((d_model,), f32),
        "w1": jax.random.normal(ks[4], (dim_ff, d_model), f32) * s,
        "b1": jnp.zeros((dim_ff,), f32),
        "w2": jax.random.normal(ks[5], (d_model, dim_ff), f32) * s,
        "b2": jnp.zeros((d_model,), f32),
        "ln1_g": jnp.ones((d_model,), f32),
        "ln1_b": jnp.zeros((d_model,), f32),
        "ln2_g": jnp.ones((d_model,), f32),
        "ln2_b": jnp.zeros((d_model,), f32),
    }


def prepare_layer_params(p):
    """Fuse Q/K weights and pre-transpose all weights to (Din, Dout) once."""
    return {
        "w_qk_t": jnp.concatenate([p["wq"], p["wk"]], axis=0).T,   # (D, 2D)
        "b_qk": jnp.concatenate([p["bq"], p["bk"]], axis=0),       # (2D,)
        "wv_t": p["wv"].T, "bv": p["bv"],
        "wo_t": p["wo"].T, "bo": p["bo"],
        "w1_t": p["w1"].T, "b1": p["b1"],
        "w2_t": p["w2"].T, "b2": p["b2"],
        "ln1_g": p["ln1_g"], "ln1_b": p["ln1_b"],
        "ln2_g": p["ln2_g"], "ln2_b": p["ln2_b"],
    }


if __name__ == "__main__":
    S, B, D = 8, 2, 32
    NHEAD, DIM_FF, NUM_LAYERS = 4, 64, 2

    root = jax.random.PRNGKey(0)
    k_src, k_pos, k_par = jax.random.split(root, 3)

    src = jax.random.normal(k_src, (S, B, D), jnp.float32)       # (S, B, D)
    pos_enc = jax.random.normal(k_pos, (S, B, D), jnp.float32)
    # True = padded key (last two positions of batch 1 are padding).
    key_padding_mask = jnp.zeros((B, S), jnp.bool_).at[1, -2:].set(True)
    attn_mask = None

    # _get_clones deep-copies one encoder_layer -> all layers start with identical params.
    base_params = prepare_layer_params(init_layer_params(k_par, D, DIM_FF))
    stacked_params = jax.tree_util.tree_map(
        lambda x: jnp.stack([x] * NUM_LAYERS), base_params)

    fwd = jax.jit(functools.partial(transformer_encoder, nhead=NHEAD))
    out = fwd(src, stacked_params, key_padding_mask, pos_enc, attn_mask)
    out = jax.block_until_ready(out)
    assert out.shape == (S, B, D) and bool(jnp.all(jnp.isfinite(out)))
    print("KERNEL_OK")
</pallas_src>

<mosaic_0001>
module attributes {stable_mosaic.version = 11 : i64} {
  func.func @_linear_add_ln_kernel(%arg0: i32, %arg1: memref<16x32xf32, #tpu.memory_space<vmem>>, %arg2: memref<32x32xf32, #tpu.memory_space<vmem>>, %arg3: memref<1x32xf32, #tpu.memory_space<vmem>>, %arg4: memref<16x32xf32, #tpu.memory_space<vmem>>, %arg5: memref<1x32xf32, #tpu.memory_space<vmem>>, %arg6: memref<1x32xf32, #tpu.memory_space<vmem>>, %arg7: memref<16x32xf32, #tpu.memory_space<vmem>>) attributes {dimension_semantics = [#tpu.dimension_semantics<parallel>], iteration_bounds = array<i64: 1>, scalar_prefetch = 0 : i64, scratch_operands = 0 : i64, tpu.core_type = #tpu.core_type<tc>, window_params = [{transform_indices = @transform_0, window_bounds = array<i64: 16, 32>}, {pipeline_mode = #tpu.pipeline_mode<synchronous>, transform_indices = @transform_1, window_bounds = array<i64: 32, 32>}, {pipeline_mode = #tpu.pipeline_mode<synchronous>, transform_indices = @transform_2, window_bounds = array<i64: 1, 32>}, {transform_indices = @transform_3, window_bounds = array<i64: 16, 32>}, {pipeline_mode = #tpu.pipeline_mode<synchronous>, transform_indices = @transform_4, window_bounds = array<i64: 1, 32>}, {pipeline_mode = #tpu.pipeline_mode<synchronous>, transform_indices = @transform_5, window_bounds = array<i64: 1, 32>}, {transform_indices = @transform_6, window_bounds = array<i64: 16, 32>}]} {
    %c0 = arith.constant 0 : index
    %c0_0 = arith.constant 0 : index
    %0 = vector.load %arg1[%c0, %c0_0] : memref<16x32xf32, #tpu.memory_space<vmem>>, vector<16x32xf32>
    %c0_1 = arith.constant 0 : index
    %c0_2 = arith.constant 0 : index
    %1 = vector.load %arg2[%c0_1, %c0_2] : memref<32x32xf32, #tpu.memory_space<vmem>>, vector<32x32xf32>
    %cst = arith.constant dense<0.000000e+00> : vector<16x32xf32>
    %2 = tpu.matmul %0, %1, %cst {dimension_numbers = #tpu.dot_dimension_numbers<[1], [0], [0], [1], [0, 0, 1, 1], [], []>} : vector<16x32xf32>, vector<32x32xf32>, vector<16x32xf32> -> vector<16x32xf32>
    %c0_3 = arith.constant 0 : index
    %c0_4 = arith.constant 0 : index
    %3 = vector.load %arg3[%c0_3, %c0_4] : memref<1x32xf32, #tpu.memory_space<vmem>>, vector<1x32xf32>
    %4 = vector.broadcast %3 : vector<1x32xf32> to vector<16x32xf32>
    %5 = arith.addf %2, %4 : vector<16x32xf32>
    %c0_5 = arith.constant 0 : index
    %c0_6 = arith.constant 0 : index
    %6 = vector.load %arg4[%c0_5, %c0_6] : memref<16x32xf32, #tpu.memory_space<vmem>>, vector<16x32xf32>
    %7 = arith.addf %5, %6 : vector<16x32xf32>
    %cst_7 = arith.constant dense<0.000000e+00> : vector<16xf32>
    %8 = vector.multi_reduction <add>, %7, %cst_7 [1] : vector<16x32xf32> to vector<16xf32>
    %9 = vector.shape_cast %8 : vector<16xf32> to vector<16x1xf32>
    %cst_8 = arith.constant 3.200000e+01 : f32
    %10 = vector.broadcast %cst_8 : f32 to vector<16x1xf32>
    %11 = arith.divf %9, %10 : vector<16x1xf32>
    %12 = vector.broadcast %11 : vector<16x1xf32> to vector<16x32xf32>
    %13 = arith.subf %7, %12 : vector<16x32xf32>
    %14 = arith.mulf %13, %13 : vector<16x32xf32>
    %cst_9 = arith.constant dense<0.000000e+00> : vector<16xf32>
    %15 = vector.multi_reduction <add>, %14, %cst_9 [1] : vector<16x32xf32> to vector<16xf32>
    %16 = vector.shape_cast %15 : vector<16xf32> to vector<16x1xf32>
    %cst_10 = arith.constant 3.200000e+01 : f32
    %17 = vector.broadcast %cst_10 : f32 to vector<16x1xf32>
    %18 = arith.divf %16, %17 : vector<16x1xf32>
    %19 = vector.broadcast %11 : vector<16x1xf32> to vector<16x32xf32>
    %20 = arith.subf %7, %19 : vector<16x32xf32>
    %cst_11 = arith.constant 9.99999974E-6 : f32
    %21 = vector.broadcast %cst_11 : f32 to vector<16x1xf32>
    %22 = arith.addf %18, %21 : vector<16x1xf32>
    %23 = math.rsqrt %22 : vector<16x1xf32>
    %24 = vector.broadcast %23 : vector<16x1xf32> to vector<16x32xf32>
    %25 = arith.mulf %20, %24 : vector<16x32xf32>
    %c0_12 = arith.constant 0 : index
    %c0_13 = arith.constant 0 : index
    %26 = vector.load %arg5[%c0_12, %c0_13] : memref<1x32xf32, #tpu.memory_space<vmem>>, vector<1x32xf32>
    %27 = vector.broadcast %26 : vector<1x32xf32> to vector<16x32xf32>
    %28 = arith.mulf %25, %27 : vector<16x32xf32>
    %c0_14 = arith.constant 0 : index
    %c0_15 = arith.constant 0 : index
    %29 = vector.load %arg6[%c0_14, %c0_15] : memref<1x32xf32, #tpu.memory_space<vmem>>, vector<1x32xf32>
    %30 = vector.broadcast %29 : vector<1x32xf32> to vector<16x32xf32>
    %31 = arith.addf %28, %30 : vector<16x32xf32>
    %c0_16 = arith.constant 0 : index
    %c0_17 = arith.constant 0 : index
    %32 = vector.load %arg7[%c0_16, %c0_17] : memref<16x32xf32, #tpu.memory_space<vmem>>, vector<16x32xf32>
    tpu.vector_store %arg7[%c0_16, %c0_17], %31 {strides = array<i32>} : memref<16x32xf32, #tpu.memory_space<vmem>>, vector<16x32xf32>,
    return
  }
  func.func @transform_0(%arg0: i32) -> (i32, i32) {
    %c0_i32 = arith.constant 0 : i32
    %c0_i32_0 = arith.constant 0 : i32
    return %arg0, %c0_i32 : i32, i32
  }
  func.func @transform_1(%arg0: i32) -> (i32, i32) {
    %c0_i32 = arith.constant 0 : i32
    %c0_i32_0 = arith.constant 0 : i32
    %c0_i32_1 = arith.constant 0 : i32
    return %c0_i32, %c0_i32_0 : i32, i32
  }
  func.func @transform_2(%arg0: i32) -> (i32, i32) {
    %c0_i32 = arith.constant 0 : i32
    %c0_i32_0 = arith.constant 0 : i32
    %c0_i32_1 = arith.constant 0 : i32
    return %c0_i32, %c0_i32_0 : i32, i32
  }
  func.func @transform_3(%arg0: i32) -> (i32, i32) {
    %c0_i32 = arith.constant 0 : i32
    %c0_i32_0 = arith.constant 0 : i32
    return %arg0, %c0_i32 : i32, i32
  }
  func.func @transform_4(%arg0: i32) -> (i32, i32) {
    %c0_i32 = arith.constant 0 : i32
    %c0_i32_0 = arith.constant 0 : i32
    %c0_i32_1 = arith.constant 0 : i32
    return %c0_i32, %c0_i32_0 : i32, i32
  }
  func.func @transform_5(%arg0: i32) -> (i32, i32) {
    %c0_i32 = arith.constant 0 : i32
    %c0_i32_0 = arith.constant 0 : i32
    %c0_i32_1 = arith.constant 0 : i32
    return %c0_i32, %c0_i32_0 : i32, i32
  }
  func.func @transform_6(%arg0: i32) -> (i32, i32) {
    %c0_i32 = arith.constant 0 : i32
    %c0_i32_0 = arith.constant 0 : i32
    return %arg0, %c0_i32 : i32, i32
  }
}

module attributes {stable_mosaic.version = 11 : i64} {
  func.func @_linear_kernel(%arg0: i32, %arg1: i32, %arg2: memref<16x32xf32, #tpu.memory_space<vmem>>, %arg3: memref<32x64xf32, #tpu.memory_space<vmem>>, %arg4: memref<1x64xf32, #tpu.memory_space<vmem>>, %arg5: memref<16x64xf32, #tpu.memory_space<vmem>>) attributes {dimension_semantics = [#tpu.dimension_semantics<parallel>, #tpu.dimension_semantics<parallel>], iteration_bounds = array<i64: 1, 1>, scalar_prefetch = 0 : i64, scratch_operands = 0 : i64, tpu.core_type = #tpu.core_type<tc>, window_params = [{transform_indices = @transform_0, window_bounds = array<i64: 16, 32>}, {transform_indices = @transform_1, window_bounds = array<i64: 32, 64>}, {transform_indices = @transform_2, window_bounds = array<i64: 1, 64>}, {transform_indices = @transform_3, window_bounds = array<i64: 16, 64>}]} {
    %c0 = arith.constant 0 : index
    %c0_0 = arith.constant 0 : index
    %0 = vector.load %arg2[%c0, %c0_0] : memref<16x32xf32, #tpu.memory_space<vmem>>, vector<16x32xf32>
    %c0_1 = arith.constant 0 : index
    %c0_2 = arith.constant 0 : index
    %1 = vector.load %arg3[%c0_1, %c0_2] : memref<32x64xf32, #tpu.memory_space<vmem>>, vector<32x64xf32>
    %cst = arith.constant dense<0.000000e+00> : vector<16x64xf32>
    %2 = tpu.matmul %0, %1, %cst {dimension_numbers = #tpu.dot_dimension_numbers<[1], [0], [0], [1], [0, 0, 1, 1], [], []>} : vector<16x32xf32>, vector<32x64xf32>, vector<16x64xf32> -> vector<16x64xf32>
    %c0_3 = arith.constant 0 : index
    %c0_4 = arith.constant 0 : index
    %3 = vector.load %arg4[%c0_3, %c0_4] : memref<1x64xf32, #tpu.memory_space<vmem>>, vector<1x64xf32>
    %4 = vector.broadcast %3 : vector<1x64xf32> to vector<16x64xf32>
    %5 = arith.addf %2, %4 : vector<16x64xf32>
    %c0_5 = arith.constant 0 : index
    %c0_6 = arith.constant 0 : index
    %6 = vector.load %arg5[%c0_5, %c0_6] : memref<16x64xf32, #tpu.memory_space<vmem>>, vector<16x64xf32>
    tpu.vector_store %arg5[%c0_5, %c0_6], %5 {strides = array<i32>} : memref<16x64xf32, #tpu.memory_space<vmem>>, vector<16x64xf32>,
    return
  }
  func.func @transform_0(%arg0: i32, %arg1: i32) -> (i32, i32) {
    %c0_i32 = arith.constant 0 : i32
    %c0_i32_0 = arith.constant 0 : i32
    return %arg0, %c0_i32 : i32, i32
  }
  func.func @transform_1(%arg0: i32, %arg1: i32) -> (i32, i32) {
    %c0_i32 = arith.constant 0 : i32
    %c0_i32_0 = arith.constant 0 : i32
    return %c0_i32, %arg1 : i32, i32
  }
  func.func @transform_2(%arg0: i32, %arg1: i32) -> (i32, i32) {
    %c0_i32 = arith.constant 0 : i32
    %c0_i32_0 = arith.constant 0 : i32
    return %c0_i32, %arg1 : i32, i32
  }
  func.func @transform_3(%arg0: i32, %arg1: i32) -> (i32, i32) {
    %c0_i32 = arith.constant 0 : i32
    return %arg0, %arg1 : i32, i32
  }
}

module attributes {stable_mosaic.version = 11 : i64} {
  func.func @_linear_kernel(%arg0: i32, %arg1: i32, %arg2: memref<16x32xf32, #tpu.memory_space<vmem>>, %arg3: memref<32x32xf32, #tpu.memory_space<vmem>>, %arg4: memref<1x32xf32, #tpu.memory_space<vmem>>, %arg5: memref<16x32xf32, #tpu.memory_space<vmem>>) attributes {dimension_semantics = [#tpu.dimension_semantics<parallel>, #tpu.dimension_semantics<parallel>], iteration_bounds = array<i64: 1, 1>, scalar_prefetch = 0 : i64, scratch_operands = 0 : i64, tpu.core_type = #tpu.core_type<tc>, window_params = [{transform_indices = @transform_0, window_bounds = array<i64: 16, 32>}, {transform_indices = @transform_1, window_bounds = array<i64: 32, 32>}, {transform_indices = @transform_2, window_bounds = array<i64: 1, 32>}, {transform_indices = @transform_3, window_bounds = array<i64: 16, 32>}]} {
    %c0 = arith.constant 0 : index
    %c0_0 = arith.constant 0 : index
    %0 = vector.load %arg2[%c0, %c0_0] : memref<16x32xf32, #tpu.memory_space<vmem>>, vector<16x32xf32>
    %c0_1 = arith.constant 0 : index
    %c0_2 = arith.constant 0 : index
    %1 = vector.load %arg3[%c0_1, %c0_2] : memref<32x32xf32, #tpu.memory_space<vmem>>, vector<32x32xf32>
    %cst = arith.constant dense<0.000000e+00> : vector<16x32xf32>
    %2 = tpu.matmul %0, %1, %cst {dimension_numbers = #tpu.dot_dimension_numbers<[1], [0], [0], [1], [0, 0, 1, 1], [], []>} : vector<16x32xf32>, vector<32x32xf32>, vector<16x32xf32> -> vector<16x32xf32>
    %c0_3 = arith.constant 0 : index
    %c0_4 = arith.constant 0 : index
    %3 = vector.load %arg4[%c0_3, %c0_4] : memref<1x32xf32, #tpu.memory_space<vmem>>, vector<1x32xf32>
    %4 = vector.broadcast %3 : vector<1x32xf32> to vector<16x32xf32>
    %5 = arith.addf %2, %4 : vector<16x32xf32>
    %c0_5 = arith.constant 0 : index
    %c0_6 = arith.constant 0 : index
    %6 = vector.load %arg5[%c0_5, %c0_6] : memref<16x32xf32, #tpu.memory_space<vmem>>, vector<16x32xf32>
    tpu.vector_store %arg5[%c0_5, %c0_6], %5 {strides = array<i32>} : memref<16x32xf32, #tpu.memory_space<vmem>>, vector<16x32xf32>,
    return
  }
  func.func @transform_0(%arg0: i32, %arg1: i32) -> (i32, i32) {
    %c0_i32 = arith.constant 0 : i32
    %c0_i32_0 = arith.constant 0 : i32
    return %arg0, %c0_i32 : i32, i32
  }
  func.func @transform_1(%arg0: i32, %arg1: i32) -> (i32, i32) {
    %c0_i32 = arith.constant 0 : i32
    %c0_i32_0 = arith.constant 0 : i32
    return %c0_i32, %arg1 : i32, i32
  }
  func.func @transform_2(%arg0: i32, %arg1: i32) -> (i32, i32) {
    %c0_i32 = arith.constant 0 : i32
    %c0_i32_0 = arith.constant 0 : i32
    return %c0_i32, %arg1 : i32, i32
  }
  func.func @transform_3(%arg0: i32, %arg1: i32) -> (i32, i32) {
    %c0_i32 = arith.constant 0 : i32
    return %arg0, %arg1 : i32, i32
  }
}

module attributes {stable_mosaic.version = 11 : i64} {
  func.func @_attn_kernel(%arg0: i32, %arg1: memref<1x8x32xf32, #tpu.memory_space<vmem>>, %arg2: memref<1x8x32xf32, #tpu.memory_space<vmem>>, %arg3: memref<1x8x32xf32, #tpu.memory_space<vmem>>, %arg4: memref<1x1x8xf32, #tpu.memory_space<vmem>>, %arg5: memref<8x8xf32, #tpu.memory_space<vmem>>, %arg6: memref<1x8x32xf32, #tpu.memory_space<vmem>>) attributes {dimension_semantics = [#tpu.dimension_semantics<parallel>], iteration_bounds = array<i64: 2>, scalar_prefetch = 0 : i64, scratch_operands = 0 : i64, tpu.core_type = #tpu.core_type<tc>, window_params = [{transform_indices = @transform_0, window_bounds = array<i64: 1, 8, 32>}, {transform_indices = @transform_1, window_bounds = array<i64: 1, 8, 32>}, {transform_indices = @transform_2, window_bounds = array<i64: 1, 8, 32>}, {transform_indices = @transform_3, window_bounds = array<i64: 1, 1, 8>}, {pipeline_mode = #tpu.pipeline_mode<synchronous>, transform_indices = @transform_4, window_bounds = array<i64: 8, 8>}, {transform_indices = @transform_5, window_bounds = array<i64: 1, 8, 32>}]} {
    %c0 = arith.constant 0 : index
    %c0_0 = arith.constant 0 : index
    %c0_1 = arith.constant 0 : index
    %0 = vector.load %arg1[%c0, %c0_0, %c0_1] : memref<1x8x32xf32, #tpu.memory_space<vmem>>, vector<1x8x32xf32>
    %1 = vector.shape_cast %0 : vector<1x8x32xf32> to vector<8x32xf32>
    %cst = arith.constant 0.353553385 : f32
    %2 = vector.broadcast %cst : f32 to vector<8x32xf32>
    %3 = arith.mulf %1, %2 : vector<8x32xf32>
    %c0_2 = arith.constant 0 : index
    %c0_3 = arith.constant 0 : index
    %c0_4 = arith.constant 0 : index
    %4 = vector.load %arg2[%c0_2, %c0_3, %c0_4] : memref<1x8x32xf32, #tpu.memory_space<vmem>>, vector<1x8x32xf32>
    %5 = vector.shape_cast %4 : vector<1x8x32xf32> to vector<8x32xf32>
    %c0_5 = arith.constant 0 : index
    %c0_6 = arith.constant 0 : index
    %c0_7 = arith.constant 0 : index
    %6 = vector.load %arg3[%c0_5, %c0_6, %c0_7] : memref<1x8x32xf32, #tpu.memory_space<vmem>>, vector<1x8x32xf32>
    %7 = vector.shape_cast %6 : vector<1x8x32xf32> to vector<8x32xf32>
    %c0_8 = arith.constant 0 : index
    %c0_9 = arith.constant 0 : index
    %8 = vector.load %arg5[%c0_8, %c0_9] : memref<8x8xf32, #tpu.memory_space<vmem>>, vector<8x8xf32>
    %c0_10 = arith.constant 0 : index
    %c0_11 = arith.constant 0 : index
    %c0_12 = arith.constant 0 : index
    %9 = vector.load %arg4[%c0_10, %c0_11, %c0_12] : memref<1x1x8xf32, #tpu.memory_space<vmem>>, vector<1x1x8xf32>
    %10 = vector.shape_cast %9 : vector<1x1x8xf32> to vector<1x8xf32>
    %11 = vector.broadcast %10 : vector<1x8xf32> to vector<8x8xf32>
    %12 = arith.addf %8, %11 : vector<8x8xf32>
    %13 = vector.extract_strided_slice %3 {offsets = [0, 0], sizes = [8, 8], strides = [1, 1]} : vector<8x32xf32> to vector<8x8xf32>
    %14 = vector.extract_strided_slice %5 {offsets = [0, 0], sizes = [8, 8], strides = [1, 1]} : vector<8x32xf32> to vector<8x8xf32>
    %15 = vector.extract_strided_slice %7 {offsets = [0, 0], sizes = [8, 8], strides = [1, 1]} : vector<8x32xf32> to vector<8x8xf32>
    %cst_13 = arith.constant dense<0.000000e+00> : vector<8x8xf32>
    %16 = tpu.matmul %13, %14, %cst_13 {dimension_numbers = #tpu.dot_dimension_numbers<[1], [1], [0], [0], [0, 0, 1, 0], [], []>} : vector<8x8xf32>, vector<8x8xf32>, vector<8x8xf32> -> vector<8x8xf32>
    %17 = arith.addf %16, %12 : vector<8x8xf32>
    %cst_14 = arith.constant dense<0xFF800000> : vector<8xf32>
    %18 = vector.multi_reduction <maximumf>, %17, %cst_14 [1] : vector<8x8xf32> to vector<8xf32>
    %19 = vector.shape_cast %18 : vector<8xf32> to vector<8x1xf32>
    %20 = vector.broadcast %19 : vector<8x1xf32> to vector<8x8xf32>
    %21 = arith.subf %17, %20 : vector<8x8xf32>
    %22 = math.exp %21 : vector<8x8xf32>
    %cst_15 = arith.constant dense<0.000000e+00> : vector<8xf32>
    %23 = vector.multi_reduction <add>, %22, %cst_15 [1] : vector<8x8xf32> to vector<8xf32>
    %24 = vector.shape_cast %23 : vector<8xf32> to vector<8x1xf32>
    %25 = tpu.reciprocal %24 {approx = true} : vector<8x1xf32> -> vector<8x1xf32>
    %26 = vector.broadcast %25 : vector<8x1xf32> to vector<8x8xf32>
    %27 = arith.mulf %22, %26 : vector<8x8xf32>
    %cst_16 = arith.constant dense<0.000000e+00> : vector<8x8xf32>
    %28 = tpu.matmul %27, %15, %cst_16 {dimension_numbers = #tpu.dot_dimension_numbers<[1], [0], [0], [1], [0, 0, 1, 1], [], []>} : vector<8x8xf32>, vector<8x8xf32>, vector<8x8xf32> -> vector<8x8xf32>
    %29 = vector.extract_strided_slice %3 {offsets = [0, 8], sizes = [8, 8], strides = [1, 1]} : vector<8x32xf32> to vector<8x8xf32>
    %30 = vector.extract_strided_slice %5 {offsets = [0, 8], sizes = [8, 8], strides = [1, 1]} : vector<8x32xf32> to vector<8x8xf32>
    %31 = vector.extract_strided_slice %7 {offsets = [0, 8], sizes = [8, 8], strides = [1, 1]} : vector<8x32xf32> to vector<8x8xf32>
    %cst_17 = arith.constant dense<0.000000e+00> : vector<8x8xf32>
    %32 = tpu.matmul %29, %30, %cst_17 {dimension_numbers = #tpu.dot_dimension_numbers<[1], [1], [0], [0], [0, 0, 1, 0], [], []>} : vector<8x8xf32>, vector<8x8xf32>, vector<8x8xf32> -> vector<8x8xf32>
    %33 = arith.addf %32, %12 : vector<8x8xf32>
    %cst_18 = arith.constant dense<0xFF800000> : vector<8xf32>
    %34 = vector.multi_reduction <maximumf>, %33, %cst_18 [1] : vector<8x8xf32> to vector<8xf32>
    %35 = vector.shape_cast %34 : vector<8xf32> to vector<8x1xf32>
    %36 = vector.broadcast %35 : vector<8x1xf32> to vector<8x8xf32>
    %37 = arith.subf %33, %36 : vector<8x8xf32>
    %38 = math.exp %37 : vector<8x8xf32>
    %cst_19 = arith.constant dense<0.000000e+00> : vector<8xf32>
    %39 = vector.multi_reduction <add>, %38, %cst_19 [1] : vector<8x8xf32> to vector<8xf32>
    %40 = vector.shape_cast %39 : vector<8xf32> to vector<8x1xf32>
    %41 = tpu.reciprocal %40 {approx = true} : vector<8x1xf32> -> vector<8x1xf32>
    %42 = vector.broadcast %41 : vector<8x1xf32> to vector<8x8xf32>
    %43 = arith.mulf %38, %42 : vector<8x8xf32>
    %cst_20 = arith.constant dense<0.000000e+00> : vector<8x8xf32>
    %44 = tpu.matmul %43, %31, %cst_20 {dimension_numbers = #tpu.dot_dimension_numbers<[1], [0], [0], [1], [0, 0, 1, 1], [], []>} : vector<8x8xf32>, vector<8x8xf32>, vector<8x8xf32> -> vector<8x8xf32>
    %45 = vector.extract_strided_slice %3 {offsets = [0, 16], sizes = [8, 8], strides = [1, 1]} : vector<8x32xf32> to vector<8x8xf32>
    %46 = vector.extract_strided_slice %5 {offsets = [0, 16], sizes = [8, 8], strides = [1, 1]} : vector<8x32xf32> to vector<8x8xf32>
    %47 = vector.extract_strided_slice %7 {offsets = [0, 16], sizes = [8, 8], strides = [1, 1]} : vector<8x32xf32> to vector<8x8xf32>
    %cst_21 = arith.constant dense<0.000000e+00> : vector<8x8xf32>
    %48 = tpu.matmul %45, %46, %cst_21 {dimension_numbers = #tpu.dot_dimension_numbers<[1], [1], [0], [0], [0, 0, 1, 0], [], []>} : vector<8x8xf32>, vector<8x8xf32>, vector<8x8xf32> -> vector<8x8xf32>
    %49 = arith.addf %48, %12 : vector<8x8xf32>
    %cst_22 = arith.constant dense<0xFF800000> : vector<8xf32>
    %50 = vector.multi_reduction <maximumf>, %49, %cst_22 [1] : vector<8x8xf32> to vector<8xf32>
    %51 = vector.shape_cast %50 : vector<8xf32> to vector<8x1xf32>
    %52 = vector.broadcast %51 : vector<8x1xf32> to vector<8x8xf32>
    %53 = arith.subf %49, %52 : vector<8x8xf32>
    %54 = math.exp %53 : vector<8x8xf32>
    %cst_23 = arith.constant dense<0.000000e+00> : vector<8xf32>
    %55 = vector.multi_reduction <add>, %54, %cst_23 [1] : vector<8x8xf32> to vector<8xf32>
    %56 = vector.shape_cast %55 : vector<8xf32> to vector<8x1xf32>
    %57 = tpu.reciprocal %56 {approx = true} : vector<8x1xf32> -> vector<8x1xf32>
    %58 = vector.broadcast %57 : vector<8x1xf32> to vector<8x8xf32>
    %59 = arith.mulf %54, %58 : vector<8x8xf32>
    %cst_24 = arith.constant dense<0.000000e+00> : vector<8x8xf32>
    %60 = tpu.matmul %59, %47, %cst_24 {dimension_numbers = #tpu.dot_dimension_numbers<[1], [0], [0], [1], [0, 0, 1, 1], [], []>} : vector<8x8xf32>, vector<8x8xf32>, vector<8x8xf32> -> vector<8x8xf32>
    %61 = vector.extract_strided_slice %3 {offsets = [0, 24], sizes = [8, 8], strides = [1, 1]} : vector<8x32xf32> to vector<8x8xf32>
    %62 = vector.extract_strided_slice %5 {offsets = [0, 24], sizes = [8, 8], strides = [1, 1]} : vector<8x32xf32> to vector<8x8xf32>
    %63 = vector.extract_strided_slice %7 {offsets = [0, 24], sizes = [8, 8], strides = [1, 1]} : vector<8x32xf32> to vector<8x8xf32>
    %cst_25 = arith.constant dense<0.000000e+00> : vector<8x8xf32>
    %64 = tpu.matmul %61, %62, %cst_25 {dimension_numbers = #tpu.dot_dimension_numbers<[1], [1], [0], [0], [0, 0, 1, 0], [], []>} : vector<8x8xf32>, vector<8x8xf32>, vector<8x8xf32> -> vector<8x8xf32>
    %65 = arith.addf %64, %12 : vector<8x8xf32>
    %cst_26 = arith.constant dense<0xFF800000> : vector<8xf32>
    %66 = vector.multi_reduction <maximumf>, %65, %cst_26 [1] : vector<8x8xf32> to vector<8xf32>
    %67 = vector.shape_cast %66 : vector<8xf32> to vector<8x1xf32>
    %68 = vector.broadcast %67 : vector<8x1xf32> to vector<8x8xf32>
    %69 = arith.subf %65, %68 : vector<8x8xf32>
    %70 = math.exp %69 : vector<8x8xf32>
    %cst_27 = arith.constant dense<0.000000e+00> : vector<8xf32>
    %71 = vector.multi_reduction <add>, %70, %cst_27 [1] : vector<8x8xf32> to vector<8xf32>
    %72 = vector.shape_cast %71 : vector<8xf32> to vector<8x1xf32>
    %73 = tpu.reciprocal %72 {approx = true} : vector<8x1xf32> -> vector<8x1xf32>
    %74 = vector.broadcast %73 : vector<8x1xf32> to vector<8x8xf32>
    %75 = arith.mulf %70, %74 : vector<8x8xf32>
    %cst_28 = arith.constant dense<0.000000e+00> : vector<8x8xf32>
    %76 = tpu.matmul %75, %63, %cst_28 {dimension_numbers = #tpu.dot_dimension_numbers<[1], [0], [0], [1], [0, 0, 1, 1], [], []>} : vector<8x8xf32>, vector<8x8xf32>, vector<8x8xf32> -> vector<8x8xf32>
    %77 = tpu.concatenate %28, %44, %60, %76 in 1 : vector<8x8xf32>, vector<8x8xf32>, vector<8x8xf32>, vector<8x8xf32> -> vector<8x32xf32>
    %c0_29 = arith.constant 0 : index
    %c0_30 = arith.constant 0 : index
    %c0_31 = arith.constant 0 : index
    %78 = vector.load %arg6[%c0_29, %c0_30, %c0_31] : memref<1x8x32xf32, #tpu.memory_space<vmem>>, vector<1x8x32xf32>
    %79 = vector.shape_cast %78 : vector<1x8x32xf32> to vector<8x32xf32>
    %80 = vector.shape_cast %77 : vector<8x32xf32> to vector<1x8x32xf32>
    tpu.vector_store %arg6[%c0_29, %c0_30, %c0_31], %80 {strides = array<i32>} : memref<1x8x32xf32, #tpu.memory_space<vmem>>, vector<1x8x32xf32>,
    return
  }
  func.func @transform_0(%arg0: i32) -> (i32, i32, i32) {
    %c0_i32 = arith.constant 0 : i32
    %c0_i32_0 = arith.constant 0 : i32
    %c0_i32_1 = arith.constant 0 : i32
    return %arg0, %c0_i32, %c0_i32_0 : i32, i32, i32
  }
  func.func @transform_1(%arg0: i32) -> (i32, i32, i32) {
    %c0_i32 = arith.constant 0 : i32
    %c0_i32_0 = arith.constant 0 : i32
    %c0_i32_1 = arith.constant 0 : i32
    return %arg0, %c0_i32, %c0_i32_0 : i32, i32, i32
  }
  func.func @transform_2(%arg0: i32) -> (i32, i32, i32) {
    %c0_i32 = arith.constant 0 : i32
    %c0_i32_0 = arith.constant 0 : i32
    %c0_i32_1 = arith.constant 0 : i32
    return %arg0, %c0_i32, %c0_i32_0 : i32, i32, i32
  }
  func.func @transform_3(%arg0: i32) -> (i32, i32, i32) {
    %c0_i32 = arith.constant 0 : i32
    %c0_i32_0 = arith.constant 0 : i32
    %c0_i32_1 = arith.constant 0 : i32
    return %arg0, %c0_i32, %c0_i32_0 : i32, i32, i32
  }
  func.func @transform_4(%arg0: i32) -> (i32, i32) {
    %c0_i32 = arith.constant 0 : i32
    %c0_i32_0 = arith.constant 0 : i32
    %c0_i32_1 = arith.constant 0 : i32
    return %c0_i32, %c0_i32_0 : i32, i32
  }
  func.func @transform_5(%arg0: i32) -> (i32, i32, i32) {
    %c0_i32 = arith.constant 0 : i32
    %c0_i32_0 = arith.constant 0 : i32
    %c0_i32_1 = arith.constant 0 : i32
    return %arg0, %c0_i32, %c0_i32_0 : i32, i32, i32
  }
}

module attributes {stable_mosaic.version = 11 : i64} {
  func.func @_linear_kernel(%arg0: i32, %arg1: i32, %arg2: memref<16x32xf32, #tpu.memory_space<vmem>>, %arg3: memref<32x64xf32, #tpu.memory_space<vmem>>, %arg4: memref<1x64xf32, #tpu.memory_space<vmem>>, %arg5: memref<16x64xf32, #tpu.memory_space<vmem>>) attributes {dimension_semantics = [#tpu.dimension_semantics<parallel>, #tpu.dimension_semantics<parallel>], iteration_bounds = array<i64: 1, 1>, scalar_prefetch = 0 : i64, scratch_operands = 0 : i64, tpu.core_type = #tpu.core_type<tc>, window_params = [{transform_indices = @transform_0, window_bounds = array<i64: 16, 32>}, {transform_indices = @transform_1, window_bounds = array<i64: 32, 64>}, {transform_indices = @transform_2, window_bounds = array<i64: 1, 64>}, {transform_indices = @transform_3, window_bounds = array<i64: 16, 64>}]} {
    %c0 = arith.constant 0 : index
    %c0_0 = arith.constant 0 : index
    %0 = vector.load %arg2[%c0, %c0_0] : memref<16x32xf32, #tpu.memory_space<vmem>>, vector<16x32xf32>
    %c0_1 = arith.constant 0 : index
    %c0_2 = arith.constant 0 : index
    %1 = vector.load %arg3[%c0_1, %c0_2] : memref<32x64xf32, #tpu.memory_space<vmem>>, vector<32x64xf32>
    %cst = arith.constant dense<0.000000e+00> : vector<16x64xf32>
    %2 = tpu.matmul %0, %1, %cst {dimension_numbers = #tpu.dot_dimension_numbers<[1], [0], [0], [1], [0, 0, 1, 1], [], []>} : vector<16x32xf32>, vector<32x64xf32>, vector<16x64xf32> -> vector<16x64xf32>
    %c0_3 = arith.constant 0 : index
    %c0_4 = arith.constant 0 : index
    %3 = vector.load %arg4[%c0_3, %c0_4] : memref<1x64xf32, #tpu.memory_space<vmem>>, vector<1x64xf32>
    %4 = vector.broadcast %3 : vector<1x64xf32> to vector<16x64xf32>
    %5 = arith.addf %2, %4 : vector<16x64xf32>
    %cst_5 = arith.constant 0.000000e+00 : f32
    %6 = vector.broadcast %cst_5 : f32 to vector<16x64xf32>
    %7 = arith.maximumf %5, %6 : vector<16x64xf32>
    %c0_6 = arith.constant 0 : index
    %c0_7 = arith.constant 0 : index
    %8 = vector.load %arg5[%c0_6, %c0_7] : memref<16x64xf32, #tpu.memory_space<vmem>>, vector<16x64xf32>
    tpu.vector_store %arg5[%c0_6, %c0_7], %7 {strides = array<i32>} : memref<16x64xf32, #tpu.memory_space<vmem>>, vector<16x64xf32>,
    return
  }
  func.func @transform_0(%arg0: i32, %arg1: i32) -> (i32, i32) {
    %c0_i32 = arith.constant 0 : i32
    %c0_i32_0 = arith.constant 0 : i32
    return %arg0, %c0_i32 : i32, i32
  }
  func.func @transform_1(%arg0: i32, %arg1: i32) -> (i32, i32) {
    %c0_i32 = arith.constant 0 : i32
    %c0_i32_0 = arith.constant 0 : i32
    return %c0_i32, %arg1 : i32, i32
  }
  func.func @transform_2(%arg0: i32, %arg1: i32) -> (i32, i32) {
    %c0_i32 = arith.constant 0 : i32
    %c0_i32_0 = arith.constant 0 : i32
    return %c0_i32, %arg1 : i32, i32
  }
  func.func @transform_3(%arg0: i32, %arg1: i32) -> (i32, i32) {
    %c0_i32 = arith.constant 0 : i32
    return %arg0, %arg1 : i32, i32
  }
}

module attributes {stable_mosaic.version = 11 : i64} {
  func.func @_linear_add_ln_kernel(%arg0: i32, %arg1: memref<16x64xf32, #tpu.memory_space<vmem>>, %arg2: memref<64x32xf32, #tpu.memory_space<vmem>>, %arg3: memref<1x32xf32, #tpu.memory_space<vmem>>, %arg4: memref<16x32xf32, #tpu.memory_space<vmem>>, %arg5: memref<1x32xf32, #tpu.memory_space<vmem>>, %arg6: memref<1x32xf32, #tpu.memory_space<vmem>>, %arg7: memref<16x32xf32, #tpu.memory_space<vmem>>) attributes {dimension_semantics = [#tpu.dimension_semantics<parallel>], iteration_bounds = array<i64: 1>, scalar_prefetch = 0 : i64, scratch_operands = 0 : i64, tpu.core_type = #tpu.core_type<tc>, window_params = [{transform_indices = @transform_0, window_bounds = array<i64: 16, 64>}, {pipeline_mode = #tpu.pipeline_mode<synchronous>, transform_indices = @transform_1, window_bounds = array<i64: 64, 32>}, {pipeline_mode = #tpu.pipeline_mode<synchronous>, transform_indices = @transform_2, window_bounds = array<i64: 1, 32>}, {transform_indices = @transform_3, window_bounds = array<i64: 16, 32>}, {pipeline_mode = #tpu.pipeline_mode<synchronous>, transform_indices = @transform_4, window_bounds = array<i64: 1, 32>}, {pipeline_mode = #tpu.pipeline_mode<synchronous>, transform_indices = @transform_5, window_bounds = array<i64: 1, 32>}, {transform_indices = @transform_6, window_bounds = array<i64: 16, 32>}]} {
    %c0 = arith.constant 0 : index
    %c0_0 = arith.constant 0 : index
    %0 = vector.load %arg1[%c0, %c0_0] : memref<16x64xf32, #tpu.memory_space<vmem>>, vector<16x64xf32>
    %c0_1 = arith.constant 0 : index
    %c0_2 = arith.constant 0 : index
    %1 = vector.load %arg2[%c0_1, %c0_2] : memref<64x32xf32, #tpu.memory_space<vmem>>, vector<64x32xf32>
    %cst = arith.constant dense<0.000000e+00> : vector<16x32xf32>
    %2 = tpu.matmul %0, %1, %cst {dimension_numbers = #tpu.dot_dimension_numbers<[1], [0], [0], [1], [0, 0, 1, 1], [], []>} : vector<16x64xf32>, vector<64x32xf32>, vector<16x32xf32> -> vector<16x32xf32>
    %c0_3 = arith.constant 0 : index
    %c0_4 = arith.constant 0 : index
    %3 = vector.load %arg3[%c0_3, %c0_4] : memref<1x32xf32, #tpu.memory_space<vmem>>, vector<1x32xf32>
    %4 = vector.broadcast %3 : vector<1x32xf32> to vector<16x32xf32>
    %5 = arith.addf %2, %4 : vector<16x32xf32>
    %c0_5 = arith.constant 0 : index
    %c0_6 = arith.constant 0 : index
    %6 = vector.load %arg4[%c0_5, %c0_6] : memref<16x32xf32, #tpu.memory_space<vmem>>, vector<16x32xf32>
    %7 = arith.addf %5, %6 : vector<16x32xf32>
    %cst_7 = arith.constant dense<0.000000e+00> : vector<16xf32>
    %8 = vector.multi_reduction <add>, %7, %cst_7 [1] : vector<16x32xf32> to vector<16xf32>
    %9 = vector.shape_cast %8 : vector<16xf32> to vector<16x1xf32>
    %cst_8 = arith.constant 3.200000e+01 : f32
    %10 = vector.broadcast %cst_8 : f32 to vector<16x1xf32>
    %11 = arith.divf %9, %10 : vector<16x1xf32>
    %12 = vector.broadcast %11 : vector<16x1xf32> to vector<16x32xf32>
    %13 = arith.subf %7, %12 : vector<16x32xf32>
    %14 = arith.mulf %13, %13 : vector<16x32xf32>
    %cst_9 = arith.constant dense<0.000000e+00> : vector<16xf32>
    %15 = vector.multi_reduction <add>, %14, %cst_9 [1] : vector<16x32xf32> to vector<16xf32>
    %16 = vector.shape_cast %15 : vector<16xf32> to vector<16x1xf32>
    %cst_10 = arith.constant 3.200000e+01 : f32
    %17 = vector.broadcast %cst_10 : f32 to vector<16x1xf32>
    %18 = arith.divf %16, %17 : vector<16x1xf32>
    %19 = vector.broadcast %11 : vector<16x1xf32> to vector<16x32xf32>
    %20 = arith.subf %7, %19 : vector<16x32xf32>
    %cst_11 = arith.constant 9.99999974E-6 : f32
    %21 = vector.broadcast %cst_11 : f32 to vector<16x1xf32>
    %22 = arith.addf %18, %21 : vector<16x1xf32>
    %23 = math.rsqrt %22 : vector<16x1xf32>
    %24 = vector.broadcast %23 : vector<16x1xf32> to vector<16x32xf32>
    %25 = arith.mulf %20, %24 : vector<16x32xf32>
    %c0_12 = arith.constant 0 : index
    %c0_13 = arith.constant 0 : index
    %26 = vector.load %arg5[%c0_12, %c0_13] : memref<1x32xf32, #tpu.memory_space<vmem>>, vector<1x32xf32>
    %27 = vector.broadcast %26 : vector<1x32xf32> to vector<16x32xf32>
    %28 = arith.mulf %25, %27 : vector<16x32xf32>
    %c0_14 = arith.constant 0 : index
    %c0_15 = arith.constant 0 : index
    %29 = vector.load %arg6[%c0_14, %c0_15] : memref<1x32xf32, #tpu.memory_space<vmem>>, vector<1x32xf32>
    %30 = vector.broadcast %29 : vector<1x32xf32> to vector<16x32xf32>
    %31 = arith.addf %28, %30 : vector<16x32xf32>
    %c0_16 = arith.constant 0 : index
    %c0_17 = arith.constant 0 : index
    %32 = vector.load %arg7[%c0_16, %c0_17] : memref<16x32xf32, #tpu.memory_space<vmem>>, vector<16x32xf32>
    tpu.vector_store %arg7[%c0_16, %c0_17], %31 {strides = array<i32>} : memref<16x32xf32, #tpu.memory_space<vmem>>, vector<16x32xf32>,
    return
  }
  func.func @transform_0(%arg0: i32) -> (i32, i32) {
    %c0_i32 = arith.constant 0 : i32
    %c0_i32_0 = arith.constant 0 : i32
    return %arg0, %c0_i32 : i32, i32
  }
  func.func @transform_1(%arg0: i32) -> (i32, i32) {
    %c0_i32 = arith.constant 0 : i32
    %c0_i32_0 = arith.constant 0 : i32
    %c0_i32_1 = arith.constant 0 : i32
    return %c0_i32, %c0_i32_0 : i32, i32
  }
  func.func @transform_2(%arg0: i32) -> (i32, i32) {
    %c0_i32 = arith.constant 0 : i32
    %c0_i32_0 = arith.constant 0 : i32
    %c0_i32_1 = arith.constant 0 : i32
    return %c0_i32, %c0_i32_0 : i32, i32
  }
  func.func @transform_3(%arg0: i32) -> (i32, i32) {
    %c0_i32 = arith.constant 0 : i32
    %c0_i32_0 = arith.constant 0 : i32
    return %arg0, %c0_i32 : i32, i32
  }
  func.func @transform_4(%arg0: i32) -> (i32, i32) {
    %c0_i32 = arith.constant 0 : i32
    %c0_i32_0 = arith.constant 0 : i32
    %c0_i32_1 = arith.constant 0 : i32
    return %c0_i32, %c0_i32_0 : i32, i32
  }
  func.func @transform_5(%arg0: i32) -> (i32, i32) {
    %c0_i32 = arith.constant 0 : i32
    %c0_i32_0 = arith.constant 0 : i32
    %c0_i32_1 = arith.constant 0 : i32
    return %c0_i32, %c0_i32_0 : i32, i32
  }
  func.func @transform_6(%arg0: i32) -> (i32, i32) {
    %c0_i32 = arith.constant 0 : i32
    %c0_i32_0 = arith.constant 0 : i32
    return %arg0, %c0_i32 : i32, i32
  }
}

</mosaic_0001>

<bundles_post_ra>
// kernel: closed_call.19
= control target key start
LH: loop header
LB: loop body
LE: loop exit
PB: predicated region body
PF: predicated region fallthrough
CT: control target
= control target key end

     0   :  { %vm27_vm0 = vcmask 261120   ;;  %vm109_vm1 = vcmask 523264   ;;  %s191_s1 = inlined_call_operand.vmem [shape: f32[32,64], index: 1, kind: input, shape index: {}]   ;;  %s192_s0 = inlined_call_operand.vmem [shape: f32[16,32], index: 0, kind: input, shape index: {}]   ;;  %s193_s2 = inlined_call_operand.vmem [shape: f32[1,64], index: 2, kind: input, shape index: {}]   ;;  %s194_s3 = inlined_call_operand.vmem [shape: f32[16,64], index: 3, kind: output, shape index: {}]  }
   0x1   :  { %v16_v0 = vld [vmem:[%s191_s1] sm:$0xff]  ;;  %v17_v1 = vld [vmem:[%s191_s1 + $0x8] sm:$0xff]  ;;  %v18_v2 = vld [vmem:[%s191_s1 + $0x10] sm:$0xff] }
   0x2   :  { %v136_v3 = vpack.c.bf16 %v17_v1, %v16_v0  ;;  %v19_v4 = vld [vmem:[%s191_s1 + $0x18] sm:$0xff]  ;;  %v14_v5 = vld [vmem:[%s192_s0] sm:$0xff]  ;;  %v15_v7 = vld [vmem:[%s192_s0 + $0x8] sm:$0xff] }
   0x3   :  { %v140_v6 = vpack.c.bf16 %v19_v4, %v18_v2  ;;  %133 = vmatprep.mubr.msk.f32.mxu0 %vm27_vm0, %v14_v5  ;;  %v116_v8 = vld [vmem:[%s193_s2] ss:$0 sm:$0xff] }
   0x4   :  { %137 = vmatprep.subr.bf16.mxu0 %v136_v3 }
   0x5   :  { %139 = vmatpush3.bf16.msra.mxu0 %v136_v3 }
   0x6   :  { %141 = vmatprep.subr.bf16.mxu0 %v140_v6 }
   0x9   :  { %143 = vmatpush3.bf16.msra.mxu0 %v140_v6 }
   0xc   :  { %134 = vmatmul.mubr.msk.f32.vlgmr.msra.gmra.mrb[0].mxu0 %vm27_vm0, %v15_v7 }
  0xdf   :  { %v135_v9 = vpop.f32.mrb[0].mxu0 }
  0xe0   :  { %v106_v10 = vadd.f32 %v135_v9, %v116_v8  ;;  %v100_v11 = vpop.f32.mrb[1].mxu0 }
  0xe1   :  { %v101_v12 = vadd.f32 %v116_v8, %v100_v11 }
  0xe2   :  { %111 = vst.msk [vmem:[%s194_s3 + $0x8] sm:$0xff] %vm109_vm1, %v106_v10 }
  0xe3   :  { %110 = vst.msk [vmem:[%s194_s3] sm:$0xff] %vm109_vm1, %v101_v12 }

// kernel: closed_call.22
= control target key start
LH: loop header
LB: loop body
LE: loop exit
PB: predicated region body
PF: predicated region fallthrough
CT: control target
= control target key end

     0   :  { %vm36_vm0 = vcmask 261120   ;;  %s289_s1 = inlined_call_operand.vmem [shape: f32[32,32], index: 1, kind: input, shape index: {}]   ;;  %s290_s0 = inlined_call_operand.vmem [shape: f32[16,32], index: 0, kind: input, shape index: {}]   ;;  %s291_s2 = inlined_call_operand.vmem [shape: f32[1,32], index: 2, kind: input, shape index: {}]   ;;  %s292_s3 = inlined_call_operand.vmem [shape: f32[16,32], index: 3, kind: input, shape index: {}]   ;;  %s293_s4 = inlined_call_operand.vmem [shape: f32[1,32], index: 4, kind: input, shape index: {}]   ;;  %s294_s5 = inlined_call_operand.vmem [shape: f32[1,32], index: 5, kind: input, shape index: {}]   ;;  %s295_s6 = inlined_call_operand.vmem [shape: f32[16,32], index: 6, kind: output, shape index: {}]  }
   0x1   :  { %v25_v0 = vld [vmem:[%s289_s1] sm:$0xff]  ;;  %v26_v1 = vld [vmem:[%s289_s1 + $0x8] sm:$0xff]  ;;  %v27_v2 = vld [vmem:[%s289_s1 + $0x10] sm:$0xff] }
   0x2   :  { %v195_v3 = vpack.c.bf16 %v26_v1, %v25_v0  ;;  %v28_v4 = vld [vmem:[%s289_s1 + $0x18] sm:$0xff]  ;;  %v23_v5 = vld [vmem:[%s290_s0] sm:$0xff]  ;;  %v24_v7 = vld [vmem:[%s290_s0 + $0x8] sm:$0xff] }
   0x3   :  { %v199_v6 = vpack.c.bf16 %v28_v4, %v27_v2  ;;  %192 = vmatprep.mubr.msk.f32.mxu0 %vm36_vm0, %v23_v5  ;;  %v173_v8 = vld [vmem:[%s291_s2] ss:$0 sm:$0xff]  ;;  %v119_v14 = vld [vmem:[%s292_s3 + $0x8] sm:$0xff] }
   0x4   :  { %196 = vmatprep.subr.bf16.mxu0 %v195_v3  ;;  %v118_v11 = vld [vmem:[%s292_s3] sm:$0xff] }
   0x5   :  { %198 = vmatpush3.bf16.msra.mxu0 %v195_v3  ;;  %v176_v36 = vld [vmem:[%s293_s4] ss:$0 sm:$0xff] }
   0x6   :  { %200 = vmatprep.subr.bf16.mxu0 %v199_v6  ;;  %v177_v38 = vld [vmem:[%s294_s5] ss:$0 sm:$0xff] }
   0x9   :  { %202 = vmatpush3.bf16.msra.mxu0 %v199_v6 }
   0xc   :  { %193 = vmatmul.mubr.msk.f32.vlgmr.msra.gmra.mrb[0].mxu0 %vm36_vm0, %v24_v7 }
  0xdf   :  { %v194_v9 = vpop.f32.mrb[0].mxu0 }
  0xe0   :  { %v109_v10 = vpop.f32.mrb[1].mxu0  ;;  %v115_v12 = vadd.f32 %v194_v9, %v173_v8 }
  0xe1   :  { %v110_v13 = vadd.f32 %v173_v8, %v109_v10 }
  0xe2   :  { %v121_v17 = vadd.f32 %v119_v14, %v115_v12 }
  0xe3   :  { %v120_v15 = vadd.f32 %v118_v11, %v110_v13 }
  0xe4   :  { %v125_v18 = vsel %vm36_vm0, %v121_v17, 0.0 }
  0xe5   :  { %v122_v16 = vsel %vm36_vm0, %v120_v15, 0.0 }
  0xe6   :  { %123 = vadd.xlane.f32.xlu0 %v122_v16 }
  0xea   :  { %126 = vadd.xlane.f32.xlu0 %v125_v18 }
 0x173   :  { %v124_v19 = vpop.xlane.xlu0 %123 }
 0x174   :  { %v129_v20 = vmul.f32 0.03125, %v124_v19 }
 0x176   :  { %v131_v21 = vsub.f32 %v120_v15, %v129_v20 }
 0x177   :  { %v127_v22 = vpop.xlane.xlu0 %126 }
 0x178   :  { %v130_v23 = vmul.f32 0.03125, %v127_v22  ;;  %v133_v24 = vmul.f32 %v131_v21, %v131_v21 }
 0x17a   :  { %v132_v25 = vsub.f32 %v121_v17, %v130_v23  ;;  %v135_v26 = vsel %vm36_vm0, %v133_v24, 0.0 }
 0x17b   :  { %136 = vadd.xlane.f32.xlu1 %v135_v26 }
 0x17c   :  { %v134_v27 = vmul.f32 %v132_v25, %v132_v25 }
 0x17e   :  { %v138_v28 = vsel %vm36_vm0, %v134_v27, 0.0 }
 0x17f   :  { %139 = vadd.xlane.f32.xlu1 %v138_v28 }
 0x208   :  { %v137_v29 = vpop.xlane.xlu1 %136 }
 0x209   :  { %v141_v30 = vmul.f32 0.03125, %v137_v29 }
 0x20b   :  { %v143_v31 = vadd.f32 1e-05, %v141_v30 }
 0x20c   :  { %v140_v32 = vpop.xlane.xlu1 %139 }
 0x20d   :  { %203 = vrsqrt.f32 %v143_v31  ;;  %v142_v33 = vmul.f32 0.03125, %v140_v32 }
 0x20f   :  { %v144_v34 = vadd.f32 1e-05, %v142_v33 }
 0x211   :  { %205 = vrsqrt.f32 %v144_v34 }
 0x217   :  { %v204_v35 = vpop.eup %203 }
 0x218   :  { %v147_v37 = vmul.f32 %v204_v35, %v131_v21 }
 0x21a   :  { %v156_v39 = vmul.f32 %v176_v36, %v147_v37 }
 0x21b   :  { %v206_v40 = vpop.eup %205 }
 0x21c   :  { %v165_v41 = vadd.f32 %v177_v38, %v156_v39  ;;  %v148_v42 = vmul.f32 %v206_v40, %v132_v25 }
 0x21e   :  { %167 = vst.msk [vmem:[%s295_s6] sm:$0xff] %vm36_vm0, %v165_v41  ;;  %v157_v43 = vmul.f32 %v176_v36, %v148_v42 }
 0x220   :  { %v166_v44 = vadd.f32 %v177_v38, %v157_v43 }
 0x222   :  { %168 = vst.msk [vmem:[%s295_s6 + $0x8] sm:$0xff] %vm36_vm0, %v166_v44 }

// kernel: closed_call.20
= control target key start
LH: loop header
LB: loop body
LE: loop exit
PB: predicated region body
PF: predicated region fallthrough
CT: control target
= control target key end

     0   :  { %vm27_vm0 = vcmask 261120   ;;  %s194_s1 = inlined_call_operand.vmem [shape: f32[32,32], index: 1, kind: input, shape index: {}]   ;;  %s195_s0 = inlined_call_operand.vmem [shape: f32[16,32], index: 0, kind: input, shape index: {}]   ;;  %s196_s2 = inlined_call_operand.vmem [shape: f32[1,32], index: 2, kind: input, shape index: {}]   ;;  %s197_s3 = inlined_call_operand.vmem [shape: f32[16,32], index: 3, kind: output, shape index: {}]  }
   0x1   :  { %v16_v0 = vld [vmem:[%s194_s1] sm:$0xff]  ;;  %v17_v1 = vld [vmem:[%s194_s1 + $0x8] sm:$0xff]  ;;  %v18_v2 = vld [vmem:[%s194_s1 + $0x10] sm:$0xff] }
   0x2   :  { %v135_v3 = vpack.c.bf16 %v17_v1, %v16_v0  ;;  %v19_v4 = vld [vmem:[%s194_s1 + $0x18] sm:$0xff]  ;;  %v14_v5 = vld [vmem:[%s195_s0] sm:$0xff]  ;;  %v15_v7 = vld [vmem:[%s195_s0 + $0x8] sm:$0xff] }
   0x3   :  { %v139_v6 = vpack.c.bf16 %v19_v4, %v18_v2  ;;  %132 = vmatprep.mubr.msk.f32.mxu0 %vm27_vm0, %v14_v5  ;;  %v115_v8 = vld [vmem:[%s196_s2] ss:$0 sm:$0xff] }
   0x4   :  { %136 = vmatprep.subr.bf16.mxu0 %v135_v3 }
   0x5   :  { %138 = vmatpush3.bf16.msra.mxu0 %v135_v3 }
   0x6   :  { %140 = vmatprep.subr.bf16.mxu0 %v139_v6 }
   0x9   :  { %142 = vmatpush3.bf16.msra.mxu0 %v139_v6 }
   0xc   :  { %133 = vmatmul.mubr.msk.f32.vlgmr.msra.gmra.mrb[0].mxu0 %vm27_vm0, %v15_v7 }
  0xdf   :  { %v134_v9 = vpop.f32.mrb[0].mxu0 }
  0xe0   :  { %v106_v10 = vadd.f32 %v134_v9, %v115_v8  ;;  %v100_v11 = vpop.f32.mrb[1].mxu0 }
  0xe1   :  { %v101_v12 = vadd.f32 %v115_v8, %v100_v11 }
  0xe2   :  { %110 = vst.msk [vmem:[%s197_s3 + $0x8] sm:$0xff] %vm27_vm0, %v106_v10 }
  0xe3   :  { %109 = vst.msk [vmem:[%s197_s3] sm:$0xff] %vm27_vm0, %v101_v12 }

// kernel: closed_call.21
= control target key start
LH: loop header
LB: loop body
LE: loop exit
PB: predicated region body
PF: predicated region fallthrough
CT: control target
= control target key end

     0   :  { %s1201_s18 = smov 0   ;;  %s1299_s0 = inlined_call_operand.vmem [shape: f32[2,8,32], index: 0, kind: input, shape index: {}]   ;;  %s1300_s1 = inlined_call_operand.vmem [shape: f32[2,8,32], index: 1, kind: input, shape index: {}]   ;;  %s1301_s2 = inlined_call_operand.vmem [shape: f32[2,8,32], index: 2, kind: input, shape index: {}]   ;;  %s1302_s3 = inlined_call_operand.vmem [shape: f32[2,1,8], index: 3, kind: input, shape index: {}]   ;;  %s1303_s4 = inlined_call_operand.vmem [shape: f32[8,8], index: 4, kind: input, shape index: {}]   ;;  %s1304_s5 = inlined_call_operand.vmem [shape: f32[2,8,32], index: 5, kind: output, shape index: {}]  }
   0x1 LB: > { %s1043_s19 = sadd.s32 4294967295, %s1161_s18   ;;  %p1047_p0 = scmp.ge.s32.totalorder %s1161_s18, 1  ;;  %s1161_s18 = sphi %s1201_s18, %s15_s18  }
   0x2   : > { %p212_p1 = scmp.lt.s32.totalorder %s1161_s18, 3 }
   0x4   : > { %p213_p2 = pnand %p1047_p0, %p212_p1 }
   0x5   : > { %p249_p3 = scmp.lt.s32.totalorder (!%p213_p2), %s1043_s19, 1  ;;  %v1163_v0 = vmov (!%p213_p2), 0.0   ;;  %vm1164_vm0 = vmmov (!%p213_p2), 0   ;;  %vm281_vm1 = vcmask (!%p213_p2), 64512   ;;  %v272_v4 = vld [vmem:[%s1303_s4] sm:$0xff] (!%p213_p2)  ;;  %s1165_s7 = smov (!%p213_p2), 120  }
   0x6   : > { %216 = sbr.rel (%p213_p2) target bundleno = 1462 (0x5b6), region = 40  ;;  %1083 = vmatprep.subr.mxu0 (!%p213_p2), %v1163_v0  ;;  %1085 = vmatprep.mubr.msk.f32.mxu0 (!%p213_p2), %vm1164_vm0, %v1163_v0  ;;  %s1166_s8 = smov (!%p213_p2), 112   ;;  %vm951_vm2 = vcmask (!%p213_p2), 130048   ;;  %vm953_vm3 = vcmask (!%p213_p2), 195584   ;;  %vm955_vm4 = vcmask (!%p213_p2), 261120  }
   0x7   : > { %1088 = vmatprep.subr.mxu1 (!%p213_p2), %v1163_v0  ;;  %1090 = vmatprep.mubr.msk.f32.mxu1 (!%p213_p2), %vm1164_vm0, %v1163_v0  ;;  %s1167_s9 = smov (!%p213_p2), 104   ;;  %s1168_s13 = smov (!%p213_p2), 8  }
   0x8   : > { %s1169_s14 = smov (!%p213_p2), 16   ;;  %s1170_s15 = smov (!%p213_p2), 24  }
   0xd   : > { %s1306_s19 = smov (!%p249_p3, %s1043_s19), 1 }
   0xe   : > { %s1215_s20 = sshll.u32 %s1306_s19, 3  ;;  %s263_s29 = scalar_lea.vmem %s1302_s3, %s1306_s19 }
   0xf   : > { %s256_s23 = scalar_lea.vmem %s1300_s1, %s1215_s20  ;;  %s252_s26 = scalar_lea.vmem %s1299_s0, %s1215_s20  ;;  %v1052_v5 = vld [vmem:[%s263_s29] ss:$0 sm:$0xff] }
  0x10   : > { %v270_v1 = vld [vmem:[%s256_s23] sm:$0xff]  ;;  %v280_v6 = vadd.f32 %v1052_v5, %v272_v4  ;;  %s260_s12 = scalar_lea.vmem %s1301_s2, %s1215_s20  ;;  %s267_s19 = scalar_lea.vmem %s1304_s5, %s1215_s20 }
  0x11   : > { %v268_v2 = vld [vmem:[%s252_s26] sm:$0xff]  ;;  %1084 = vmatpush3.xpose.msk.msra.mxu0 %vm281_vm1, %v270_v1  ;;  %444 = vrot.lane.b32.xlu1 %v270_v1, %s1165_s7 }
  0x12   : > { %v269_v3 = vmul.f32 0.35355338, %v268_v2  ;;  %1098 = vmatprep.subr.mxu0 %v1163_v0  ;;  %v1247_v16 = vld [vmem:[%s260_s12] sm:$0xff] }
  0x13   : > { %1089 = vmatpush3.msra.mxu1 %v1247_v16 }
  0x14   : > { %1086 = vmatmul.mubr.msk.f32.vlgmr.msra.gmra.mrb[0].mxu0 %vm281_vm1, %v269_v3  ;;  %1093 = vmatprep.subr.mxu1 %v1163_v0 }
  0x15   : > { %1100 = vmatprep.mubr.msk.f32.mxu0 %vm1164_vm0, %v1163_v0  ;;  %442 = vrot.lane.b32.xlu1 %v269_v3, %s1165_s7 }
  0x19   : > { %608 = vrot.lane.b32.xlu1 %v269_v3, %s1166_s8 }
  0x1d   : > { %775 = vrot.lane.b32.xlu1 %v270_v1, %s1167_s9 }
  0x21   : > { %773 = vrot.lane.b32.xlu1 %v269_v3, %s1167_s9 }
  0x83   : > { %v445_v17 = vpop.permute.xlu1 %444 }
  0x87   : > { %v443_v19 = vpop.permute.xlu1 %442 }
  0x8b   : > { %v609_v21 = vpop.permute.xlu1 %608 }
  0x8f   : > { %v776_v24 = vpop.permute.xlu1 %775 }
  0x93   : > { %v774_v25 = vpop.permute.xlu1 %773 }
  0xe7   : > { %v354_v7 = vpop.f32.mrb[0].mxu0 }
  0xe8   : > { %v355_v8 = vadd.f32 %v354_v7, %v280_v6  ;;  %v1087_v9 = vpop.f32.mrb[1].mxu0 }
  0xea   : > { %v358_v10 = vsel %vm281_vm1, %v355_v8, -inf }
  0xeb   : > { %359 = vmax.xlane.f32.xlu0 %v358_v10 }
 0x178   : > { %v360_v11 = vpop.xlane.xlu0 %359 }
 0x179   : > { %v361_v12 = vsub.f32 %v355_v8, %v360_v11 }
 0x17b   : > { %v362_v13 = vmul.f32 1.442695, %v361_v12 }
 0x17d   : > { %1139 = vpow2.f32 %v362_v13 }
 0x187   : > { %v1140_v14 = vpop.eup %1139 }
 0x188   : > { %v364_v15 = vsel %vm281_vm1, %v1140_v14, 0.0 }
 0x189   : > { %365 = vadd.xlane.f32.xlu0 %v364_v15 }
 0x19f   : > { %610 = vrot.lane.b32.xlu0 %v270_v1, %s1166_s8 }
 0x216   : > { %v366_v18 = vpop.xlane.xlu0 %365 }
 0x217   : > { %1141 = vrcp.f32 %v366_v18 }
 0x21a   : > { %v611_v23 = vpop.permute.xlu0 %610 }
 0x221   : > { %v1142_v20 = vpop.eup %1141 }
 0x222   : > { %v368_v22 = vmul.f32 %v1142_v20, %v1140_v14 }
 0x224   : > { %1091 = vmatmul.mubr.msk.f32.vlgmr.msra.gmra.mrb[0].mxu1 %vm281_vm1, %v368_v22 }
 0x225   : > { %1094 = vmatpush3.xpose.msk.msra.mxu1 %vm281_vm1, %v445_v17  ;;  %1095 = vmatprep.mubr.msk.f32.mxu1 %vm1164_vm0, %v1163_v0 }
 0x226   : > { %1103 = vmatprep.subr.mxu1 %v1163_v0 }
 0x228   : > { %1096 = vmatmul.mubr.msk.f32.vlgmr.msra.gmra.mrb[2].mxu1 %vm281_vm1, %v443_v19 }
 0x229   : > { %1104 = vmatpush3.xpose.msk.msra.mxu1 %vm281_vm1, %v611_v23  ;;  %1105 = vmatprep.mubr.msk.f32.mxu1 %vm1164_vm0, %v1163_v0 }
 0x22a   : > { %1113 = vmatprep.subr.mxu1 %v1163_v0 }
 0x22c   : > { %1106 = vmatmul.mubr.msk.f32.vlgmr.msra.gmra.mrb[4].mxu1 %vm281_vm1, %v609_v21 }
 0x22d   : > { %1114 = vmatpush3.xpose.msk.msra.mxu1 %vm281_vm1, %v776_v24  ;;  %1115 = vmatprep.mubr.msk.f32.mxu1 %vm1164_vm0, %v1163_v0 }
 0x230   : > { %1116 = vmatmul.mubr.msk.f32.vlgmr.msra.gmra.mrb[6].mxu1 %vm281_vm1, %v774_v25 }
 0x2f7   : > { %v1267_v26 = vpop.f32.mrb[0].mxu1 }
 0x2f8   : > { %v1092_v27 = vpop.f32.mrb[1].mxu1 }
 0x2fb   : > { %v516_v28 = vpop.f32.mrb[2].mxu1 }
 0x2fc   : > { %v517_v29 = vadd.f32 %v516_v28, %v280_v6  ;;  %v1097_v30 = vpop.f32.mrb[3].mxu1 }
 0x2fe   : > { %v520_v31 = vsel %vm281_vm1, %v517_v29, -inf }
 0x2ff   : > { %521 = vmax.xlane.f32.xlu1 %v520_v31  ;;  %v682_v32 = vpop.f32.mrb[4].mxu1 }
 0x300   : > { %v683_v33 = vadd.f32 %v682_v32, %v280_v6  ;;  %v1107_v34 = vpop.f32.mrb[5].mxu1 }
 0x302   : > { %v686_v35 = vsel %vm281_vm1, %v683_v33, -inf }
 0x303   : > { %687 = vmax.xlane.f32.xlu0 %v686_v35  ;;  %v847_v36 = vpop.f32.mrb[6].mxu1 }
 0x304   : > { %v848_v37 = vadd.f32 %v847_v36, %v280_v6  ;;  %v1117_v38 = vpop.f32.mrb[7].mxu1 }
 0x306   : > { %v851_v39 = vsel %vm281_vm1, %v848_v37, -inf }
 0x307   : > { %852 = vmax.xlane.f32.xlu1 %v851_v39 }
 0x38c   : > { %v522_v40 = vpop.xlane.xlu1 %521 }
 0x38d   : > { %v523_v41 = vsub.f32 %v517_v29, %v522_v40 }
 0x38f   : > { %v524_v42 = vmul.f32 1.442695, %v523_v41 }
 0x390   : > { %v688_v43 = vpop.xlane.xlu0 %687 }
 0x391   : > { %1143 = vpow2.f32 %v524_v42  ;;  %v689_v44 = vsub.f32 %v683_v33, %v688_v43 }
 0x393   : > { %v690_v45 = vmul.f32 1.442695, %v689_v44 }
 0x394   : > { %v853_v50 = vpop.xlane.xlu1 %852 }
 0x395   : > { %1145 = vpow2.f32 %v690_v45  ;;  %v854_v51 = vsub.f32 %v848_v37, %v853_v50 }
 0x397   : > { %v855_v52 = vmul.f32 1.442695, %v854_v51 }
 0x399   : > { %1147 = vpow2.f32 %v855_v52 }
 0x39b   : > { %v1144_v46 = vpop.eup %1143 }
 0x39c   : > { %v526_v47 = vsel %vm281_vm1, %v1144_v46, 0.0 }
 0x39d   : > { %527 = vadd.xlane.f32.xlu1 %v526_v47 }
 0x39f   : > { %v1146_v48 = vpop.eup %1145 }
 0x3a0   : > { %v692_v49 = vsel %vm281_vm1, %v1146_v48, 0.0 }
 0x3a1   : > { %693 = vadd.xlane.f32.xlu0 %v692_v49 }
 0x3a3   : > { %v1148_v53 = vpop.eup %1147 }
 0x3a4   : > { %v857_v54 = vsel %vm281_vm1, %v1148_v53, 0.0 }
 0x3ae   : > { %697 = vrot.lane.b32.xlu1 %v1247_v16, %s1166_s8 }
 0x3b7   : > { %532 = vrot.lane.b32.xlu0 %v1247_v16, %s1165_s7 }
 0x3d2   : > { %858 = vadd.xlane.f32.xlu1 %v857_v54 }
 0x3e3   : > { %862 = vrot.lane.b32.xlu1 %v1247_v16, %s1167_s9 }
 0x42a   : > { %v528_v55 = vpop.xlane.xlu1 %527 }
 0x42b   : > { %1149 = vrcp.f32 %v528_v55 }
 0x42e   : > { %v694_v56 = vpop.xlane.xlu0 %693  ;;  %v698_v60 = vpop.permute.xlu1 %697 }
 0x42f   : > { %1151 = vrcp.f32 %v694_v56 }
 0x432   : > { %v533_v57 = vpop.permute.xlu0 %532 }
 0x433   : > { %1099 = vmatpush3.msra.mxu0 %v533_v57 }
 0x434   : > { %1108 = vmatprep.subr.mxu0 %v1163_v0 }
 0x435   : > { %v1150_v58 = vpop.eup %1149 }
 0x436   : > { %v530_v59 = vmul.f32 %v1150_v58, %v1144_v46 }
 0x438   : > { %1101 = vmatmul.mubr.msk.f32.vlgmr.msra.gmra.mrb[2].mxu0 %vm281_vm1, %v530_v59 }
 0x439   : > { %v1152_v61 = vpop.eup %1151  ;;  %1109 = vmatpush3.msra.mxu0 %v698_v60  ;;  %1110 = vmatprep.mubr.msk.f32.mxu0 %vm1164_vm0, %v1163_v0 }
 0x43a   : > { %v696_v62 = vmul.f32 %v1152_v61, %v1146_v48  ;;  %1118 = vmatprep.subr.mxu0 %v1163_v0 }
 0x43c   : > { %1111 = vmatmul.mubr.msk.f32.vlgmr.msra.gmra.mrb[4].mxu0 %vm281_vm1, %v696_v62 }
 0x43d   : > { %1120 = vmatprep.mubr.msk.f32.mxu0 %vm1164_vm0, %v1163_v0 }
 0x45f   : > { %v859_v63 = vpop.xlane.xlu1 %858 }
 0x460   : > { %1153 = vrcp.f32 %v859_v63 }
 0x463   : > { %v863_v1 = vpop.permute.xlu1 %862 }
 0x464   : > { %1119 = vmatpush3.msra.mxu0 %v863_v1 }
 0x46a   : > { %v1154_v2 = vpop.eup %1153 }
 0x46b   : > { %v861_v3 = vmul.f32 %v1154_v2, %v1148_v53 }
 0x46d   : > { %1121 = vmatmul.mubr.msk.f32.vlgmr.msra.gmra.mrb[6].mxu0 %vm281_vm1, %v861_v3 }
 0x50b   : > { %v604_v4 = vpop.f32.mrb[2].mxu0 }
 0x50c   : > { %939 = vrot.lane.b32.xlu0 %v604_v4, %s1168_s13  ;;  %v1102_v5 = vpop.f32.mrb[3].mxu0 }
 0x50f   : > { %v769_v6 = vpop.f32.mrb[4].mxu0 }
 0x510   : > { %943 = vrot.lane.b32.xlu1 %v769_v6, %s1169_s14  ;;  %v1112_v7 = vpop.f32.mrb[5].mxu0 }
 0x540   : > { %v934_v8 = vpop.f32.mrb[6].mxu0 }
 0x541   : > { %947 = vrot.lane.b32.xlu0 %v934_v8, %s1170_s15  ;;  %v1122_v0 = vpop.f32.mrb[7].mxu0 }
 0x57e   : > { %v940_v9 = vpop.permute.xlu0 %939 }
 0x57f   : > { %v950_v11 = vsel %vm281_vm1, %v1267_v26, %v940_v9 }
 0x582   : > { %v944_v10 = vpop.permute.xlu1 %943 }
 0x583   : > { %v952_v12 = vsel %vm951_vm2, %v950_v11, %v944_v10 }
 0x5b3   : > { %v948_v13 = vpop.permute.xlu0 %947 }
 0x5b4   : > { %v954_v14 = vsel %vm953_vm3, %v952_v12, %v948_v13 }
 0x5b5   : > { %956 = vst.msk [vmem:[%s267_s19] sm:$0xff] %vm955_vm4, %v954_v14 }
 0x5b6 PF: > { %s15_s18 = sadd.s32 1, %s1161_s18  }
 0x5b7   : > { %p12_p4 = scmp.ge.s32.totalorder %s15_s18, 4  }
 0x5b9   :  { %14 = sbr.rel (!%p12_p4) target bundleno = 1 (0x1), region = 79 }

// kernel: closed_call.23
= control target key start
LH: loop header
LB: loop body
LE: loop exit
PB: predicated region body
PF: predicated region fallthrough
CT: control target
= control target key end

     0   :  { %vm27_vm0 = vcmask 261120   ;;  %vm111_vm1 = vcmask 523264   ;;  %s193_s1 = inlined_call_operand.vmem [shape: f32[32,64], index: 1, kind: input, shape index: {}]   ;;  %s194_s0 = inlined_call_operand.vmem [shape: f32[16,32], index: 0, kind: input, shape index: {}]   ;;  %s195_s2 = inlined_call_operand.vmem [shape: f32[1,64], index: 2, kind: input, shape index: {}]   ;;  %s196_s3 = inlined_call_operand.vmem [shape: f32[16,64], index: 3, kind: output, shape index: {}]  }
   0x1   :  { %v16_v0 = vld [vmem:[%s193_s1] sm:$0xff]  ;;  %v17_v1 = vld [vmem:[%s193_s1 + $0x8] sm:$0xff]  ;;  %v18_v2 = vld [vmem:[%s193_s1 + $0x10] sm:$0xff] }
   0x2   :  { %v138_v3 = vpack.c.bf16 %v17_v1, %v16_v0  ;;  %v19_v4 = vld [vmem:[%s193_s1 + $0x18] sm:$0xff]  ;;  %v14_v5 = vld [vmem:[%s194_s0] sm:$0xff]  ;;  %v15_v7 = vld [vmem:[%s194_s0 + $0x8] sm:$0xff] }
   0x3   :  { %v142_v6 = vpack.c.bf16 %v19_v4, %v18_v2  ;;  %135 = vmatprep.mubr.msk.f32.mxu0 %vm27_vm0, %v14_v5  ;;  %v118_v8 = vld [vmem:[%s195_s2] ss:$0 sm:$0xff] }
   0x4   :  { %139 = vmatprep.subr.bf16.mxu0 %v138_v3 }
   0x5   :  { %141 = vmatpush3.bf16.msra.mxu0 %v138_v3 }
   0x6   :  { %143 = vmatprep.subr.bf16.mxu0 %v142_v6 }
   0x9   :  { %145 = vmatpush3.bf16.msra.mxu0 %v142_v6 }
   0xc   :  { %136 = vmatmul.mubr.msk.f32.vlgmr.msra.gmra.mrb[0].mxu0 %vm27_vm0, %v15_v7 }
  0xdf   :  { %v137_v9 = vpop.f32.mrb[0].mxu0 }
  0xe0   :  { %v106_v10 = vadd.f32 %v137_v9, %v118_v8  ;;  %v100_v11 = vpop.f32.mrb[1].mxu0 }
  0xe1   :  { %v101_v12 = vadd.f32 %v118_v8, %v100_v11 }
  0xe2   :  { %v110_v13 = vmax.f32 %v106_v10, 0.0 }
  0xe3   :  { %v109_v14 = vmax.f32 %v101_v12, 0.0 }
  0xe4   :  { %113 = vst.msk [vmem:[%s196_s3 + $0x8] sm:$0xff] %vm111_vm1, %v110_v13 }
  0xe5   :  { %112 = vst.msk [vmem:[%s196_s3] sm:$0xff] %vm111_vm1, %v109_v14 }

// kernel: closed_call.24
= control target key start
LH: loop header
LB: loop body
LE: loop exit
PB: predicated region body
PF: predicated region fallthrough
CT: control target
= control target key end

     0   :  { %vm40_vm0 = vcmask 523264   ;;  %vm126_vm1 = vcmask 261120   ;;  %s326_s1 = inlined_call_operand.vmem [shape: f32[64,32], index: 1, kind: input, shape index: {}]   ;;  %s327_s0 = inlined_call_operand.vmem [shape: f32[16,64], index: 0, kind: input, shape index: {}]   ;;  %s328_s2 = inlined_call_operand.vmem [shape: f32[1,32], index: 2, kind: input, shape index: {}]   ;;  %s329_s3 = inlined_call_operand.vmem [shape: f32[16,32], index: 3, kind: input, shape index: {}]   ;;  %s330_s4 = inlined_call_operand.vmem [shape: f32[1,32], index: 4, kind: input, shape index: {}]   ;;  %s331_s5 = inlined_call_operand.vmem [shape: f32[1,32], index: 5, kind: input, shape index: {}]   ;;  %s332_s6 = inlined_call_operand.vmem [shape: f32[16,32], index: 6, kind: output, shape index: {}]  }
   0x1   :  { %v25_v0 = vld [vmem:[%s326_s1] sm:$0xff]  ;;  %v26_v1 = vld [vmem:[%s326_s1 + $0x8] sm:$0xff]  ;;  %v27_v2 = vld [vmem:[%s326_s1 + $0x10] sm:$0xff] }
   0x2   :  { %v212_v3 = vpack.c.bf16 %v26_v1, %v25_v0  ;;  %v28_v4 = vld [vmem:[%s326_s1 + $0x18] sm:$0xff]  ;;  %v29_v6 = vld [vmem:[%s326_s1 + $0x20] sm:$0xff]  ;;  %v30_v7 = vld [vmem:[%s326_s1 + $0x28] sm:$0xff] }
   0x3   :  { %v216_v5 = vpack.c.bf16 %v28_v4, %v27_v2  ;;  %v23_v8 = vld [vmem:[%s327_s0] sm:$0xff]  ;;  %v220_v9 = vpack.c.bf16 %v30_v7, %v29_v6  ;;  %v31_v10 = vld [vmem:[%s326_s1 + $0x30] sm:$0xff]  ;;  %v32_v11 = vld [vmem:[%s326_s1 + $0x38] sm:$0xff] }
   0x4   :  { %213 = vmatprep.subr.bf16.mxu0 %v212_v3  ;;  %209 = vmatprep.mubr.msk.f32.mxu0 %vm40_vm0, %v23_v8  ;;  %v224_v12 = vpack.c.bf16 %v32_v11, %v31_v10  ;;  %v24_v13 = vld [vmem:[%s327_s0 + $0x8] sm:$0xff]  ;;  %v178_v14 = vld [vmem:[%s328_s2] ss:$0 sm:$0xff] }
   0x5   :  { %215 = vmatpush3.bf16.msra.mxu0 %v212_v3  ;;  %v122_v17 = vld [vmem:[%s329_s3] sm:$0xff]  ;;  %v123_v20 = vld [vmem:[%s329_s3 + $0x8] sm:$0xff] }
   0x6   :  { %217 = vmatprep.subr.bf16.mxu0 %v216_v5  ;;  %v181_v42 = vld [vmem:[%s330_s4] ss:$0 sm:$0xff] }
   0x7   :  { %v182_v44 = vld [vmem:[%s331_s5] ss:$0 sm:$0xff] }
   0x9   :  { %219 = vmatpush3.bf16.msra.mxu0 %v216_v5 }
   0xa   :  { %221 = vmatprep.subr.bf16.mxu0 %v220_v9 }
   0xd   :  { %223 = vmatpush3.bf16.msra.mxu0 %v220_v9 }
   0xe   :  { %225 = vmatprep.subr.bf16.mxu0 %v224_v12 }
  0x11   :  { %227 = vmatpush3.bf16.msra.mxu0 %v224_v12 }
  0x14   :  { %210 = vmatmul.mubr.msk.f32.vlgmr.msra.gmra.mrb[0].mxu0 %vm40_vm0, %v24_v13 }
  0xe7   :  { %v211_v15 = vpop.f32.mrb[0].mxu0 }
  0xe8   :  { %v113_v16 = vpop.f32.mrb[1].mxu0  ;;  %v119_v18 = vadd.f32 %v211_v15, %v178_v14 }
  0xe9   :  { %v114_v19 = vadd.f32 %v178_v14, %v113_v16 }
  0xea   :  { %v125_v23 = vadd.f32 %v123_v20, %v119_v18 }
  0xeb   :  { %v124_v21 = vadd.f32 %v122_v17, %v114_v19 }
  0xec   :  { %v130_v24 = vsel %vm126_vm1, %v125_v23, 0.0 }
  0xed   :  { %v127_v22 = vsel %vm126_vm1, %v124_v21, 0.0 }
  0xee   :  { %128 = vadd.xlane.f32.xlu0 %v127_v22 }
  0xf2   :  { %131 = vadd.xlane.f32.xlu0 %v130_v24 }
 0x17b   :  { %v129_v25 = vpop.xlane.xlu0 %128 }
 0x17c   :  { %v134_v26 = vmul.f32 0.03125, %v129_v25 }
 0x17e   :  { %v136_v27 = vsub.f32 %v124_v21, %v134_v26 }
 0x17f   :  { %v132_v28 = vpop.xlane.xlu0 %131 }
 0x180   :  { %v135_v29 = vmul.f32 0.03125, %v132_v28  ;;  %v138_v30 = vmul.f32 %v136_v27, %v136_v27 }
 0x182   :  { %v137_v31 = vsub.f32 %v125_v23, %v135_v29  ;;  %v140_v32 = vsel %vm126_vm1, %v138_v30, 0.0 }
 0x183   :  { %141 = vadd.xlane.f32.xlu1 %v140_v32 }
 0x184   :  { %v139_v33 = vmul.f32 %v137_v31, %v137_v31 }
 0x186   :  { %v143_v34 = vsel %vm126_vm1, %v139_v33, 0.0 }
 0x187   :  { %144 = vadd.xlane.f32.xlu1 %v143_v34 }
 0x210   :  { %v142_v35 = vpop.xlane.xlu1 %141 }
 0x211   :  { %v146_v36 = vmul.f32 0.03125, %v142_v35 }
 0x213   :  { %v148_v37 = vadd.f32 1e-05, %v146_v36 }
 0x214   :  { %v145_v38 = vpop.xlane.xlu1 %144 }
 0x215   :  { %228 = vrsqrt.f32 %v148_v37  ;;  %v147_v39 = vmul.f32 0.03125, %v145_v38 }
 0x217   :  { %v149_v40 = vadd.f32 1e-05, %v147_v39 }
 0x219   :  { %230 = vrsqrt.f32 %v149_v40 }
 0x21f   :  { %v229_v41 = vpop.eup %228 }
 0x220   :  { %v152_v43 = vmul.f32 %v229_v41, %v136_v27 }
 0x222   :  { %v161_v45 = vmul.f32 %v181_v42, %v152_v43 }
 0x223   :  { %v231_v46 = vpop.eup %230 }
 0x224   :  { %v170_v47 = vadd.f32 %v182_v44, %v161_v45  ;;  %v153_v48 = vmul.f32 %v231_v46, %v137_v31 }
 0x226   :  { %172 = vst.msk [vmem:[%s332_s6] sm:$0xff] %vm126_vm1, %v170_v47  ;;  %v162_v49 = vmul.f32 %v181_v42, %v153_v48 }
 0x228   :  { %v171_v50 = vadd.f32 %v182_v44, %v162_v49 }
 0x22a   :  { %173 = vst.msk [vmem:[%s332_s6 + $0x8] sm:$0xff] %vm126_vm1, %v171_v50 }

</bundles_post_ra>
